<compile_context>
chip_gen: v5e
topology: v5e:2x2
jax: 0.10.0
libtpu: 0.0.40
codegen_flags: <defaults>
</compile_context>

<pallas_src>
import functools

import jax
import jax.numpy as jnp
from jax import lax
from jax.experimental import pallas as pl
from jax.experimental.pallas import tpu as pltpu

INPUT_DIM = 19
HIDDEN_DIM = 64   # present in the PyTorch module but unused by its forward
OUTPUT_DIM = 1

CHUNK = 256        # lane-chunk kept register-resident through the 4-matmul chain
MAX_TB = 8192      # max batch-tile per grid step (x tile ~4 MiB/buffer in VMEM)
MIN_SPLIT = 4 * CHUNK  # batch size above which we force >= 2 grid tiles (v7x)


def _cdiv(a, b):
    return -(-a // b)


def _round_up(n, m):
    return _cdiv(n, m) * m


def cnn_kernel(x_ref, w1_ref, b1_ref, w2_ref, b2_ref,
               wf1_ref, bf1_ref, wf2_ref, bf2_ref, out_ref,
               *, chunk, num_chunks):
    # x_ref: (TB, 19) natural layout (batch on sublanes, channels on lanes).
    # out_ref: (1, TB) lane-dense.
    w1 = w1_ref[...]
    b1 = b1_ref[...]
    w2 = w2_ref[...]
    b2 = b2_ref[...]
    wf1 = wf1_ref[...]
    bf1 = bf1_ref[...]
    wf2 = wf2_ref[...]
    bf2 = bf2_ref[...]
    # Contract over both operands' dim 1: (out,in) x (chunk,in) -> (out, chunk)
    contract_last = (((1,), (1,)), ((), ()))

    def body(c, carry):
        start = pl.multiple_of(c * chunk, chunk)
        xc = x_ref[pl.ds(start, chunk), :]                          # (chunk, 19)
        # conv1 (k=1) == per-sample linear; in-kernel re-orientation to lane-dense.
        h = lax.dot_general(w1, xc, contract_last,
                            preferred_element_type=jnp.float32) + b1  # (19, chunk)
        h = jnp.maximum(h, 0.0)                       # relu; maxpool(k=1) identity
        # conv2 (k=1) + relu; maxpool(k=1) identity.
        h = jnp.dot(w2, h, preferred_element_type=jnp.float32) + b2
        h = jnp.maximum(h, 0.0)
        # x.view(B, -1) is a no-op for L == 1.  fc1 + relu.
        h = jnp.dot(wf1, h, preferred_element_type=jnp.float32) + bf1
        h = jnp.maximum(h, 0.0)
        # dropout(p=1e-5): identity in eval mode.
        # TODO(synk): training-mode dropout (stochastic mask) not implemented.
        out_ref[:, pl.ds(start, chunk)] = (
            jnp.dot(wf2, h, preferred_element_type=jnp.float32) + bf2)
        return carry

    lax.fori_loop(0, num_chunks, body, 0, unroll=True)


def prep_params(params):
    """One-time re-orientation of PyTorch-layout params to kernel layout.

    The kernel computes h = W @ x_chunk^T with x_chunk of shape (chunk, C_in),
    so weights keep the PyTorch (out, in) orientation; biases become column
    vectors for lane broadcast.
    """
    (w1, b1, w2, b2, wf1, bf1, wf2, bf2) = params
    return (
        w1[:, :, 0],                 # (19, 19)
        b1.reshape(-1, 1),           # (19, 1)
        w2[:, :, 0],                 # (19, 19)
        b2.reshape(-1, 1),           # (19, 1)
        wf1,                         # (19, 19)
        bf1.reshape(-1, 1),          # (19, 1)
        wf2,                         # (1, 19)
        bf2.reshape(-1, 1),          # (1, 1)
    )


@jax.jit
def cnn_forward(x, prepped_params):
    """x: (B, C=19, L=1) float32. prepped_params: output of prep_params.

    Returns (B, 1) float32.
    """
    B, C, L = x.shape
    assert L == 1 and C == INPUT_DIM, "model is only consistent for L == 1"

    # Layout-preserving reshape (merges trailing size-1 dim); no HBM copy.
    x2 = x.reshape(B, INPUT_DIM)

    num_tiles = _cdiv(B, MAX_TB)
    if B >= MIN_SPLIT:
        num_tiles = max(num_tiles, 2)        # keep both v7x TensorCores busy
    TB = _round_up(_cdiv(B, num_tiles), CHUNK)   # balanced, chunk-aligned tiles
    num_chunks = TB // CHUNK

    (w1, b1, w2, b2, wf1, bf1, wf2, bf2) = prepped_params

    const = lambda i: (0, 0)   # weights/biases stay resident across grid steps
    work = num_tiles * TB
    flops = work * (2 * INPUT_DIM * INPUT_DIM * 3 + 2 * INPUT_DIM * OUTPUT_DIM)
    bytes_accessed = (B * (INPUT_DIM + OUTPUT_DIM) * 4
                      + (3 * INPUT_DIM * INPUT_DIM + 3 * INPUT_DIM
                         + OUTPUT_DIM * INPUT_DIM + OUTPUT_DIM) * 4)

    out = pl.pallas_call(
        functools.partial(cnn_kernel, chunk=CHUNK, num_chunks=num_chunks),
        out_shape=jax.ShapeDtypeStruct((OUTPUT_DIM, B), jnp.float32),
        grid=(num_tiles,),
        in_specs=[
            pl.BlockSpec((TB, INPUT_DIM), lambda i: (i, 0)),        # x tile
            pl.BlockSpec((INPUT_DIM, INPUT_DIM), const),            # w1
            pl.BlockSpec((INPUT_DIM, 1), const),                    # b1
            pl.BlockSpec((INPUT_DIM, INPUT_DIM), const),            # w2
            pl.BlockSpec((INPUT_DIM, 1), const),                    # b2
            pl.BlockSpec((INPUT_DIM, INPUT_DIM), const),            # wf1
            pl.BlockSpec((INPUT_DIM, 1), const),                    # bf1
            pl.BlockSpec((OUTPUT_DIM, INPUT_DIM), const),           # wf2
            pl.BlockSpec((OUTPUT_DIM, 1), const),                   # bf2
        ],
        out_specs=pl.BlockSpec((OUTPUT_DIM, TB), lambda i: (0, i)),  # lane-dense
        compiler_params=pltpu.CompilerParams(
            dimension_semantics=("parallel",)),
        cost_estimate=pl.CostEstimate(
            flops=flops, transcendentals=0, bytes_accessed=bytes_accessed),
    )(x2, w1, b1, w2, b2, wf1, bf1, wf2, bf2)

    # (1, B) -> (B, 1): transpose of a single-row array is a free reshape.
    return out.T


def init_params(key):
    """Deterministic init mimicking PyTorch default uniform(-1/sqrt(fan_in), ...)."""
    ks = jax.random.split(key, 8)

    def u(k, shape, fan_in):
        bound = 1.0 / jnp.sqrt(fan_in)
        return jax.random.uniform(k, shape, jnp.float32, -bound, bound)

    w1 = u(ks[0], (INPUT_DIM, INPUT_DIM, 1), INPUT_DIM)   # conv1.weight (out,in,k)
    b1 = u(ks[1], (INPUT_DIM,), INPUT_DIM)                # conv1.bias
    w2 = u(ks[2], (INPUT_DIM, INPUT_DIM, 1), INPUT_DIM)   # conv2.weight
    b2 = u(ks[3], (INPUT_DIM,), INPUT_DIM)                # conv2.bias
    wf1 = u(ks[4], (INPUT_DIM, INPUT_DIM), INPUT_DIM)     # fc1.weight (out,in)
    bf1 = u(ks[5], (INPUT_DIM,), INPUT_DIM)               # fc1.bias
    wf2 = u(ks[6], (OUTPUT_DIM, INPUT_DIM), INPUT_DIM)    # fc2.weight
    bf2 = u(ks[7], (OUTPUT_DIM,), INPUT_DIM)              # fc2.bias
    return (w1, b1, w2, b2, wf1, bf1, wf2, bf2)


def reference_forward(x, params):
    (w1, b1, w2, b2, wf1, bf1, wf2, bf2) = params
    h = x[:, :, 0]
    h = jnp.maximum(h @ w1[:, :, 0].T + b1, 0.0)
    h = jnp.maximum(h @ w2[:, :, 0].T + b2, 0.0)
    h = jnp.maximum(h @ wf1.T + bf1, 0.0)
    return h @ wf2.T + bf2


if __name__ == "__main__":
    key = jax.random.PRNGKey(0)
    kx, kp = jax.random.split(key)
    B = 8
    x = jax.random.normal(kx, (B, INPUT_DIM, 1), jnp.float32)
    params = init_params(kp)
    prepped = prep_params(params)   # hoisted out of the per-call path

    out = jax.block_until_ready(cnn_forward(x, prepped))
    ref = reference_forward(x, params)
    assert out.shape == (B, OUTPUT_DIM)
    assert jnp.allclose(out, ref, atol=1e-5, rtol=1e-5), "mismatch vs JAX reference"

    # Multi-tile + partial-boundary-block path (B not a multiple of the tile).
    B2 = 4096 + 37
    x2 = jax.random.normal(jax.random.PRNGKey(1), (B2, INPUT_DIM, 1), jnp.float32)
    out2 = jax.block_until_ready(cnn_forward(x2, prepped))
    ref2 = reference_forward(x2, params)
    assert out2.shape == (B2, OUTPUT_DIM)
    assert jnp.allclose(out2, ref2, atol=1e-4, rtol=1e-4), "mismatch (large batch)"

    print("KERNEL_OK")
</pallas_src>

<mosaic_0001>
module attributes {stable_mosaic.version = 11 : i64} {
  func.func @cnn_kernel(%arg0: i32, %arg1: memref<256x19xf32, #tpu.memory_space<vmem>>, %arg2: memref<19x19xf32, #tpu.memory_space<vmem>>, %arg3: memref<19x1xf32, #tpu.memory_space<vmem>>, %arg4: memref<19x19xf32, #tpu.memory_space<vmem>>, %arg5: memref<19x1xf32, #tpu.memory_space<vmem>>, %arg6: memref<19x19xf32, #tpu.memory_space<vmem>>, %arg7: memref<19x1xf32, #tpu.memory_space<vmem>>, %arg8: memref<1x19xf32, #tpu.memory_space<vmem>>, %arg9: memref<1x1xf32, #tpu.memory_space<vmem>>, %arg10: memref<1x256xf32, #tpu.memory_space<vmem>>) attributes {dimension_semantics = [#tpu.dimension_semantics<parallel>], iteration_bounds = array<i64: 1>, scalar_prefetch = 0 : i64, scratch_operands = 0 : i64, tpu.core_type = #tpu.core_type<tc>, window_params = [{transform_indices = @transform_0, window_bounds = array<i64: 256, 19>}, {pipeline_mode = #tpu.pipeline_mode<synchronous>, transform_indices = @transform_1, window_bounds = array<i64: 19, 19>}, {pipeline_mode = #tpu.pipeline_mode<synchronous>, transform_indices = @transform_2, window_bounds = array<i64: 19, 1>}, {pipeline_mode = #tpu.pipeline_mode<synchronous>, transform_indices = @transform_3, window_bounds = array<i64: 19, 19>}, {pipeline_mode = #tpu.pipeline_mode<synchronous>, transform_indices = @transform_4, window_bounds = array<i64: 19, 1>}, {pipeline_mode = #tpu.pipeline_mode<synchronous>, transform_indices = @transform_5, window_bounds = array<i64: 19, 19>}, {pipeline_mode = #tpu.pipeline_mode<synchronous>, transform_indices = @transform_6, window_bounds = array<i64: 19, 1>}, {pipeline_mode = #tpu.pipeline_mode<synchronous>, transform_indices = @transform_7, window_bounds = array<i64: 1, 19>}, {pipeline_mode = #tpu.pipeline_mode<synchronous>, transform_indices = @transform_8, window_bounds = array<i64: 1, 1>}, {transform_indices = @transform_9, window_bounds = array<i64: 1, 256>}]} {
    %c0 = arith.constant 0 : index
    %c0_0 = arith.constant 0 : index
    %0 = vector.load %arg2[%c0, %c0_0] : memref<19x19xf32, #tpu.memory_space<vmem>>, vector<19x19xf32>
    %c0_1 = arith.constant 0 : index
    %c0_2 = arith.constant 0 : index
    %1 = vector.load %arg3[%c0_1, %c0_2] : memref<19x1xf32, #tpu.memory_space<vmem>>, vector<19x1xf32>
    %c0_3 = arith.constant 0 : index
    %c0_4 = arith.constant 0 : index
    %2 = vector.load %arg4[%c0_3, %c0_4] : memref<19x19xf32, #tpu.memory_space<vmem>>, vector<19x19xf32>
    %c0_5 = arith.constant 0 : index
    %c0_6 = arith.constant 0 : index
    %3 = vector.load %arg5[%c0_5, %c0_6] : memref<19x1xf32, #tpu.memory_space<vmem>>, vector<19x1xf32>
    %c0_7 = arith.constant 0 : index
    %c0_8 = arith.constant 0 : index
    %4 = vector.load %arg6[%c0_7, %c0_8] : memref<19x19xf32, #tpu.memory_space<vmem>>, vector<19x19xf32>
    %c0_9 = arith.constant 0 : index
    %c0_10 = arith.constant 0 : index
    %5 = vector.load %arg7[%c0_9, %c0_10] : memref<19x1xf32, #tpu.memory_space<vmem>>, vector<19x1xf32>
    %c0_11 = arith.constant 0 : index
    %c0_12 = arith.constant 0 : index
    %6 = vector.load %arg8[%c0_11, %c0_12] : memref<1x19xf32, #tpu.memory_space<vmem>>, vector<1x19xf32>
    %c0_13 = arith.constant 0 : index
    %c0_14 = arith.constant 0 : index
    %7 = vector.load %arg9[%c0_13, %c0_14] : memref<1x1xf32, #tpu.memory_space<vmem>>, vector<1x1xf32>
    %c0_i32 = arith.constant 0 : i32
    %c256_i32 = arith.constant 256 : i32
    %8 = arith.muli %c0_i32, %c256_i32 : i32
    %9 = tpu.assume_multiple %8, 256 : i32
    %10 = arith.index_cast %9 : i32 to index
    %c0_15 = arith.constant 0 : index
    %11 = vector.load %arg1[%10, %c0_15] : memref<256x19xf32, #tpu.memory_space<vmem>>, vector<256x19xf32>
    %cst = arith.constant dense<0.000000e+00> : vector<19x256xf32>
    %12 = tpu.matmul %0, %11, %cst {dimension_numbers = #tpu.dot_dimension_numbers<[1], [1], [0], [0], [0, 0, 1, 0], [], []>} : vector<19x19xf32>, vector<256x19xf32>, vector<19x256xf32> -> vector<19x256xf32>
    %13 = vector.broadcast %1 : vector<19x1xf32> to vector<19x256xf32>
    %14 = arith.addf %12, %13 : vector<19x256xf32>
    %cst_16 = arith.constant 0.000000e+00 : f32
    %15 = vector.broadcast %cst_16 : f32 to vector<19x256xf32>
    %16 = arith.maximumf %14, %15 : vector<19x256xf32>
    %cst_17 = arith.constant dense<0.000000e+00> : vector<19x256xf32>
    %17 = tpu.matmul %2, %16, %cst_17 {dimension_numbers = #tpu.dot_dimension_numbers<[1], [0], [0], [1], [0, 0, 1, 1], [], []>} : vector<19x19xf32>, vector<19x256xf32>, vector<19x256xf32> -> vector<19x256xf32>
    %18 = vector.broadcast %3 : vector<19x1xf32> to vector<19x256xf32>
    %19 = arith.addf %17, %18 : vector<19x256xf32>
    %cst_18 = arith.constant 0.000000e+00 : f32
    %20 = vector.broadcast %cst_18 : f32 to vector<19x256xf32>
    %21 = arith.maximumf %19, %20 : vector<19x256xf32>
    %cst_19 = arith.constant dense<0.000000e+00> : vector<19x256xf32>
    %22 = tpu.matmul %4, %21, %cst_19 {dimension_numbers = #tpu.dot_dimension_numbers<[1], [0], [0], [1], [0, 0, 1, 1], [], []>} : vector<19x19xf32>, vector<19x256xf32>, vector<19x256xf32> -> vector<19x256xf32>
    %23 = vector.broadcast %5 : vector<19x1xf32> to vector<19x256xf32>
    %24 = arith.addf %22, %23 : vector<19x256xf32>
    %cst_20 = arith.constant 0.000000e+00 : f32
    %25 = vector.broadcast %cst_20 : f32 to vector<19x256xf32>
    %26 = arith.maximumf %24, %25 : vector<19x256xf32>
    %cst_21 = arith.constant dense<0.000000e+00> : vector<1x256xf32>
    %27 = tpu.matmul %6, %26, %cst_21 {dimension_numbers = #tpu.dot_dimension_numbers<[1], [0], [0], [1], [0, 0, 1, 1], [], []>} : vector<1x19xf32>, vector<19x256xf32>, vector<1x256xf32> -> vector<1x256xf32>
    %28 = vector.broadcast %7 : vector<1x1xf32> to vector<1x256xf32>
    %29 = arith.addf %27, %28 : vector<1x256xf32>
    %c0_22 = arith.constant 0 : index
    %30 = arith.index_cast %9 : i32 to index
    %31 = vector.load %arg10[%c0_22, %30] : memref<1x256xf32, #tpu.memory_space<vmem>>, vector<1x256xf32>
    tpu.vector_store %arg10[%c0_22, %30], %29 {strides = array<i32>} : memref<1x256xf32, #tpu.memory_space<vmem>>, vector<1x256xf32>,
    %c1_i32 = arith.constant 1 : i32
    return
  }
  func.func @transform_0(%arg0: i32) -> (i32, i32) {
    %c0_i32 = arith.constant 0 : i32
    %c0_i32_0 = arith.constant 0 : i32
    return %arg0, %c0_i32 : i32, i32
  }
  func.func @transform_1(%arg0: i32) -> (i32, i32) {
    %c0_i32 = arith.constant 0 : i32
    %c0_i32_0 = arith.constant 0 : i32
    %c0_i32_1 = arith.constant 0 : i32
    return %c0_i32, %c0_i32_0 : i32, i32
  }
  func.func @transform_2(%arg0: i32) -> (i32, i32) {
    %c0_i32 = arith.constant 0 : i32
    %c0_i32_0 = arith.constant 0 : i32
    %c0_i32_1 = arith.constant 0 : i32
    return %c0_i32, %c0_i32_0 : i32, i32
  }
  func.func @transform_3(%arg0: i32) -> (i32, i32) {
    %c0_i32 = arith.constant 0 : i32
    %c0_i32_0 = arith.constant 0 : i32
    %c0_i32_1 = arith.constant 0 : i32
    return %c0_i32, %c0_i32_0 : i32, i32
  }
  func.func @transform_4(%arg0: i32) -> (i32, i32) {
    %c0_i32 = arith.constant 0 : i32
    %c0_i32_0 = arith.constant 0 : i32
    %c0_i32_1 = arith.constant 0 : i32
    return %c0_i32, %c0_i32_0 : i32, i32
  }
  func.func @transform_5(%arg0: i32) -> (i32, i32) {
    %c0_i32 = arith.constant 0 : i32
    %c0_i32_0 = arith.constant 0 : i32
    %c0_i32_1 = arith.constant 0 : i32
    return %c0_i32, %c0_i32_0 : i32, i32
  }
  func.func @transform_6(%arg0: i32) -> (i32, i32) {
    %c0_i32 = arith.constant 0 : i32
    %c0_i32_0 = arith.constant 0 : i32
    %c0_i32_1 = arith.constant 0 : i32
    return %c0_i32, %c0_i32_0 : i32, i32
  }
  func.func @transform_7(%arg0: i32) -> (i32, i32) {
    %c0_i32 = arith.constant 0 : i32
    %c0_i32_0 = arith.constant 0 : i32
    %c0_i32_1 = arith.constant 0 : i32
    return %c0_i32, %c0_i32_0 : i32, i32
  }
  func.func @transform_8(%arg0: i32) -> (i32, i32) {
    %c0_i32 = arith.constant 0 : i32
    %c0_i32_0 = arith.constant 0 : i32
    %c0_i32_1 = arith.constant 0 : i32
    return %c0_i32, %c0_i32_0 : i32, i32
  }
  func.func @transform_9(%arg0: i32) -> (i32, i32) {
    %c0_i32 = arith.constant 0 : i32
    %c0_i32_0 = arith.constant 0 : i32
    return %c0_i32, %arg0 : i32, i32
  }
}

</mosaic_0001>

<bundles_post_ra>
// kernel: cnn_forward.1
= control target key start
LH: loop header
LB: loop body
LE: loop exit
PB: predicated region body
PF: predicated region fallthrough
CT: control target
= control target key end

     0   :  { %s839_s0 = inlined_call_operand.hbm [shape: f32[8,19], index: 0, kind: input, shape index: {}]   ;;  %s840_s1 = inlined_call_operand.vmem [shape: f32[19,19], index: 1, kind: input, shape index: {}]   ;;  %s841_s2 = inlined_call_operand.vmem [shape: f32[19,1], index: 2, kind: input, shape index: {}]   ;;  %s842_s3 = inlined_call_operand.vmem [shape: f32[19,19], index: 3, kind: input, shape index: {}]   ;;  %s843_s4 = inlined_call_operand.vmem [shape: f32[19,1], index: 4, kind: input, shape index: {}]   ;;  %s844_s5 = inlined_call_operand.vmem [shape: f32[19,19], index: 5, kind: input, shape index: {}]   ;;  %s845_s6 = inlined_call_operand.vmem [shape: f32[19,1], index: 6, kind: input, shape index: {}]   ;;  %s846_s7 = inlined_call_operand.vmem [shape: f32[1,19], index: 7, kind: input, shape index: {}]   ;;  %s847_s8 = inlined_call_operand.<no memory space> [shape: f32[1,1], index: 8, kind: input, shape index: {}]   ;;  %s848_s9 = inlined_call_operand.hbm [shape: f32[1,8], index: 9, kind: output, shape index: {}]  }
   0x1   :  { %v14_v0 = vstv %s847_s8 }
   0x2   :  { %15 = vst [vmem:[#allocation2] sm:$0x1] %v14_v0 }
   0x3   :  { %16 = vsyncpa [#allocation4], 0 }
   0x4   :  { %17 = vsyncpa [#allocation5], 0 }
   0x5   :  { %21 = vsyncadd [#allocation4], 3968  ;;  %s22_s13 = sshll.u32 %s839_s0, 4  ;;  %s660_s14 = smov [#allocation3]   ;;  %s23_s13 = int_to_ptr.hbm [resolvable:$true] %s22_s13 }
   0x6   :  { %s24_s15 = sshll.u32 %s660_s14, 4  ;;  %s661_s16 = smov 128   ;;  %s25_s15 = int_to_ptr.vmem [resolvable:$true] %s24_s15 }
   0x7   :  { %s662_s17 = smov 8  }
   0x8   :  { %30 = dma.hbm_to_vmem [thread:$0]  %s23_s13, 128, %s25_s15, [#allocation4], %s661_s16, %s661_s16, %s662_s17  }
   0x9   :  { %656 = dma.done.wait [#allocation4], 4096  }
   0xa   :  { %657 = vsyncadd [#allocation4], 4294963200  ;;  %vm118_vm0 = vcmask 154624   ;;  %v86_v1 = vld [vmem:[#allocation3 + $0x78] sm:$0xff]  ;;  %v85_v3 = vld [vmem:[#allocation3 + $0x70] sm:$0xff]  ;;  %v663_v17 = vmov 0  }
   0xb   :  { %v102_v2 = vld [vmem:[#allocation3 + $0xf8] sm:$0xff]  ;;  %542 = vmatpush.xpose.msk.msra.mxu0 %vm118_vm0, %v86_v1  ;;  %v101_v4 = vld [vmem:[#allocation3 + $0xf0] sm:$0xff]  ;;  %v84_v5 = vld [vmem:[#allocation3 + $0x68] sm:$0xff]  ;;  %605 = vset.pattern.permute.xlu0 %v663_v17  ;;  %vm306_vm1 = vcmask 1042432   ;;  %vm517_vm2 = vcmask 1040384  }
   0xc   :  { %561 = vmatpush.xpose.msk.msra.mxu1 %vm118_vm0, %v102_v2  ;;  %v100_v6 = vld [vmem:[#allocation3 + $0xe8] sm:$0xff]  ;;  %v83_v7 = vld [vmem:[#allocation3 + $0x60] sm:$0xff]  ;;  %v82_v9 = vld [vmem:[#allocation3 + $0x58] sm:$0xff]  ;;  %606 = vset.pattern.permute.xlu1 %v663_v17 }
   0xd   :  { %v99_v8 = vld [vmem:[#allocation3 + $0xe0] sm:$0xff]  ;;  %v98_v10 = vld [vmem:[#allocation3 + $0xd8] sm:$0xff]  ;;  %v81_v11 = vld [vmem:[#allocation3 + $0x50] sm:$0xff]  ;;  %607 = vset.pattern.permute.xlu2 %v663_v17 }
   0xe   :  { %v97_v12 = vld [vmem:[#allocation3 + $0xd0] sm:$0xff]  ;;  %v80_v13 = vld [vmem:[#allocation3 + $0x48] sm:$0xff]  ;;  %v79_v15 = vld [vmem:[#allocation3 + $0x40] sm:$0xff] }
   0xf   :  { %543 = vmatpush.xpose.msk.msra.mxu0 %vm118_vm0, %v85_v3  ;;  %v96_v14 = vld [vmem:[#allocation3 + $0xc8] sm:$0xff]  ;;  %v95_v16 = vld [vmem:[#allocation3 + $0xc0] sm:$0xff]  ;;  %v78_v19 = vld [vmem:[#allocation3 + $0x38] sm:$0xff] }
  0x10   :  { %562 = vmatpush.xpose.msk.msra.mxu1 %vm118_vm0, %v101_v4  ;;  %v56_v18 = vld [vmem:[%s841_s2 + $0x10] sm:$0x7]  ;;  %v94_v20 = vld [vmem:[#allocation3 + $0xb8] sm:$0xff]  ;;  %v55_v23 = vld [vmem:[%s841_s2 + $0x8] sm:$0xff] }
  0x11   :  { %115 = vperm.xlu0 %605, %v56_v18   ;;  %v77_v21 = vld [vmem:[#allocation3 + $0x30] sm:$0xff]  ;;  %v76_v24 = vld [vmem:[#allocation3 + $0x28] sm:$0xff]  ;;  %v54_v26 = vld [vmem:[%s841_s2] sm:$0xff] }
  0x12   :  { %v93_v22 = vld [vmem:[#allocation3 + $0xb0] sm:$0xff]  ;;  %v92_v25 = vld [vmem:[#allocation3 + $0xa8] sm:$0xff]  ;;  %v75_v27 = vld [vmem:[#allocation3 + $0x20] sm:$0xff]  ;;  %105 = vperm.xlu1 %606, %v54_v26  }
  0x13   :  { %544 = vmatpush.xpose.msk.msra.mxu0 %vm118_vm0, %v84_v5  ;;  %v91_v28 = vld [vmem:[#allocation3 + $0xa0] sm:$0xff]  ;;  %v68_v29 = vld [vmem:[%s845_s6 + $0x10] sm:$0x7]  ;;  %v74_v30 = vld [vmem:[#allocation3 + $0x18] sm:$0xff] }
  0x14   :  { %563 = vmatpush.xpose.msk.msra.mxu1 %vm118_vm0, %v100_v6  ;;  %v90_v31 = vld [vmem:[#allocation3 + $0x98] sm:$0xff]  ;;  %v62_v32 = vld [vmem:[%s843_s4 + $0x10] sm:$0x7]  ;;  %v67_v38 = vld [vmem:[%s845_s6 + $0x8] sm:$0xff] }
  0x15   :  { %v73_v33 = vld [vmem:[#allocation3 + $0x10] sm:$0xff]  ;;  %v70_v35 = vld [vmem:[#allocation2] sm:$0x1]  ;;  %v72_v36 = vld [vmem:[#allocation3 + $0x8] sm:$0xff] }
  0x16   :  { %v89_v34 = vld [vmem:[#allocation3 + $0x90] sm:$0xff]  ;;  %v88_v37 = vld [vmem:[#allocation3 + $0x88] sm:$0xff]  ;;  %v71_v39 = vld [vmem:[#allocation3] sm:$0xff] }
  0x17   :  { %545 = vmatpush.xpose.msk.msra.mxu0 %vm118_vm0, %v83_v7  ;;  %v87_v40 = vld [vmem:[#allocation3 + $0x80] sm:$0xff]  ;;  %v53_v43 = vld [vmem:[%s840_s1 + $0x10] sm:$0x7] }
  0x18   :  { %564 = vmatpush.xpose.msk.msra.mxu1 %vm118_vm0, %v99_v8  ;;  %v51_v41 = vld [vmem:[%s840_s1] sm:$0xff]  ;;  %v52_v42 = vld [vmem:[%s840_s1 + $0x8] sm:$0xff]  ;;  %v59_v6 = vld [vmem:[%s842_s3 + $0x10] sm:$0x7] }
  0x19   :  { %110 = vperm.xlu0 %605, %v55_v23   ;;  %v61_v49 = vld [vmem:[%s843_s4 + $0x8] sm:$0xff]  ;;  %v60_v54 = vld [vmem:[%s843_s4] sm:$0xff] }
  0x1a   :  { %294 = vperm.xlu1 %606, %v62_v32   ;;  %289 = vperm.xlu2 %607, %v61_v49   ;;  %v57_v3 = vld [vmem:[%s842_s3] sm:$0xff]  ;;  %v58_v5 = vld [vmem:[%s842_s3 + $0x8] sm:$0xff] }
  0x1b   :  { %546 = vmatpush.xpose.msk.msra.mxu0 %vm118_vm0, %v82_v9  ;;  %v66_v4 = vld [vmem:[%s845_s6] sm:$0xff] }
  0x1c   :  { %565 = vmatpush.xpose.msk.msra.mxu1 %vm118_vm0, %v98_v10 }
  0x1f   :  { %547 = vmatpush.xpose.msk.msra.mxu0 %vm118_vm0, %v81_v11 }
  0x20   :  { %566 = vmatpush.xpose.msk.msra.mxu1 %vm118_vm0, %v97_v12 }
  0x21   :  { %383 = vperm.xlu0 %605, %v68_v29   ;;  %v64_v29 = vld [vmem:[%s844_s5 + $0x8] sm:$0xff] }
  0x22   :  { %378 = vperm.xlu1 %606, %v67_v38   ;;  %284 = vperm.xlu2 %607, %v60_v54  }
  0x23   :  { %548 = vmatpush.xpose.msk.msra.mxu0 %vm118_vm0, %v80_v13 }
  0x24   :  { %567 = vmatpush.xpose.msk.msra.mxu1 %vm118_vm0, %v96_v14 }
  0x27   :  { %549 = vmatpush.xpose.msk.msra.mxu0 %vm118_vm0, %v79_v15 }
  0x28   :  { %568 = vmatpush.xpose.msk.msra.mxu1 %vm118_vm0, %v95_v16 }
  0x29   :  { %461 = vperm.xlu0 %605, %v70_v35  }
  0x2a   :  { %373 = vperm.xlu2 %607, %v66_v4  }
  0x2b   :  { %550 = vmatpush.xpose.msk.msra.mxu0 %vm118_vm0, %v78_v19 }
  0x2c   :  { %569 = vmatpush.xpose.msk.msra.mxu1 %vm118_vm0, %v94_v20 }
  0x2f   :  { %551 = vmatpush.xpose.msk.msra.mxu0 %vm118_vm0, %v77_v21 }
  0x30   :  { %570 = vmatpush.xpose.msk.msra.mxu1 %vm118_vm0, %v93_v22 }
  0x33   :  { %552 = vmatpush.xpose.msk.msra.mxu0 %vm118_vm0, %v76_v24 }
  0x34   :  { %571 = vmatpush.xpose.msk.msra.mxu1 %vm118_vm0, %v92_v25 }
  0x37   :  { %553 = vmatpush.xpose.msk.msra.mxu0 %vm118_vm0, %v75_v27 }
  0x38   :  { %572 = vmatpush.xpose.msk.msra.mxu1 %vm118_vm0, %v91_v28  ;;  %v63_v28 = vld [vmem:[%s844_s5] sm:$0xff] }
  0x3b   :  { %554 = vmatpush.xpose.msk.msra.mxu0 %vm118_vm0, %v74_v30  ;;  %v65_v30 = vld [vmem:[%s844_s5 + $0x10] sm:$0x7] }
  0x3c   :  { %573 = vmatpush.xpose.msk.msra.mxu1 %vm118_vm0, %v90_v31 }
  0x3f   :  { %555 = vmatpush.xpose.msk.msra.mxu0 %vm118_vm0, %v73_v33 }
  0x40   :  { %574 = vmatpush.xpose.msk.msra.mxu1 %vm118_vm0, %v89_v34 }
  0x43   :  { %556 = vmatpush.xpose.msk.msra.mxu0 %vm118_vm0, %v72_v36 }
  0x44   :  { %575 = vmatpush.xpose.msk.msra.mxu1 %vm118_vm0, %v88_v37 }
  0x47   :  { %557 = vmatpush.xpose.msk.msra.mxu0 %vm118_vm0, %v71_v39 }
  0x48   :  { %576 = vmatpush.xpose.msk.msra.mxu1 %vm118_vm0, %v87_v40 }
  0x4a   :  { %558 = vmatmul.msk.f32.vlgmr.msra.gmra.mxu0 %vm118_vm0, %v51_v41 }
  0x4b   :  { %577 = vmatmul.msk.f32.vlgmr.msra.gmra.mxu1 %vm118_vm0, %v51_v41 }
  0x52   :  { %559 = vmatmul.msk.f32.gmra.mxu0 %vm118_vm0, %v52_v42 }
  0x53   :  { %578 = vmatmul.msk.f32.gmra.mxu1 %vm118_vm0, %v52_v42 }
  0x5a   :  { %560 = vmatmul.msk.f32.gmra.mxu0 %vm118_vm0, %v53_v43 }
  0x5b   :  { %579 = vmatmul.msk.f32.gmra.mxu1 %vm118_vm0, %v53_v43 }
  0x74   :  { %v290_v9 = vpop.permute.xlu2 %289 }
  0x7c   :  { %v285_v13 = vpop.permute.xlu2 %284 }
  0x83   :  { %v116_v46 = vpop.permute.xlu0 %115 }
  0x84   :  { %v106_v51 = vpop.permute.xlu1 %105  ;;  %v374_v43 = vpop.permute.xlu2 %373 }
  0x8b   :  { %v111_v50 = vpop.permute.xlu0 %110 }
  0x8c   :  { %v295_v12 = vpop.permute.xlu1 %294 }
  0x93   :  { %v384_v35 = vpop.permute.xlu0 %383 }
  0x94   :  { %v379_v36 = vpop.permute.xlu1 %378 }
  0xc7   :  { %v241_v44 = vpop.f32.mrf.mxu0 }
  0xc8   :  { %v267_v45 = vpop.f32.mrf.mxu1  ;;  %v242_v59 = vadd.f32 %v241_v44, %v106_v51 }
  0xc9   :  { %v268_v60 = vadd.f32 %v267_v45, %v106_v51 }
  0xca   :  { %v276_v1 = vmax.f32 %v242_v59, 0.0 }
  0xcb   :  { %v277_v2 = vmax.f32 %v268_v60, 0.0 }
  0xcf   :  { %v244_v47 = vpop.f32.mrf.mxu0 }
  0xd0   :  { %v270_v48 = vpop.f32.mrf.mxu1  ;;  %v245_v55 = vadd.f32 %v244_v47, %v111_v50 }
  0xd1   :  { %v271_v56 = vadd.f32 %v270_v48, %v111_v50 }
  0xd2   :  { %v278_v63 = vmax.f32 %v245_v55, 0.0  ;;  %v520_v55 = vlaneseq }
  0xd3   :  { %v279_v0 = vmax.f32 %v271_v56, 0.0 }
  0xd4   :  { %vm522_vm3 = vcmp.lt.s32.totalorder %v520_v55, 256 }
  0xd7   :  { %v247_v52 = vpop.f32.mrf.mxu0 }
  0xd8   :  { %v273_v53 = vpop.f32.mrf.mxu1  ;;  %v248_v57 = vadd.f32 %v247_v52, %v116_v46  ;;  %v69_v52 = vld [vmem:[%s846_s7] sm:$0x1] }
  0xd9   :  { %v274_v58 = vadd.f32 %v273_v53, %v116_v46  ;;  %v462_v53 = vpop.permute.xlu0 %461 }
  0xda   :  { %v280_v61 = vmax.f32 %v248_v57, 0.0  ;;  %v464_v54 = vperm.slane %v462_v53, 0 }
  0xdb   :  { %v281_v62 = vmax.f32 %v274_v58, 0.0 }
  0xdc   :  { %580 = vmatpush.msk.msra.mxu2 %vm306_vm1, %v280_v61 }
  0xdd   :  { %584 = vmatpush.msk.msra.mxu3 %vm306_vm1, %v281_v62 }
  0xde   :  { %327 = vmatpush.msra.mxu2 %v278_v63 }
  0xdf   :  { %353 = vmatpush.msra.mxu3 %v279_v0 }
  0xe0   :  { %328 = vmatpush.msra.mxu2 %v276_v1 }
  0xe1   :  { %354 = vmatpush.msra.mxu3 %v277_v2  ;;  %581 = vmatmul.msk.f32.vlgmr.msra.gmra.mxu2 %vm118_vm0, %v57_v3 }
  0xe2   :  { %585 = vmatmul.msk.f32.vlgmr.msra.gmra.mxu3 %vm118_vm0, %v57_v3 }
  0xe9   :  { %582 = vmatmul.msk.f32.gmra.mxu2 %vm118_vm0, %v58_v5 }
  0xea   :  { %586 = vmatmul.msk.f32.gmra.mxu3 %vm118_vm0, %v58_v5 }
  0xf1   :  { %583 = vmatmul.msk.f32.gmra.mxu2 %vm118_vm0, %v59_v6 }
  0xf2   :  { %587 = vmatmul.msk.f32.gmra.mxu3 %vm118_vm0, %v59_v6 }
 0x164   :  { %v330_v7 = vpop.f32.mrf.mxu2 }
 0x165   :  { %v356_v8 = vpop.f32.mrf.mxu3  ;;  %v331_v20 = vadd.f32 %v330_v7, %v285_v13 }
 0x166   :  { %v357_v21 = vadd.f32 %v356_v8, %v285_v13 }
 0x167   :  { %v365_v26 = vmax.f32 %v331_v20, 0.0 }
 0x168   :  { %v366_v27 = vmax.f32 %v357_v21, 0.0 }
 0x16c   :  { %v333_v10 = vpop.f32.mrf.mxu2 }
 0x16d   :  { %v359_v11 = vpop.f32.mrf.mxu3  ;;  %v334_v16 = vadd.f32 %v333_v10, %v290_v9 }
 0x16e   :  { %v360_v17 = vadd.f32 %v359_v11, %v290_v9 }
 0x16f   :  { %v367_v24 = vmax.f32 %v334_v16, 0.0 }
 0x170   :  { %v368_v25 = vmax.f32 %v360_v17, 0.0 }
 0x174   :  { %v336_v14 = vpop.f32.mrf.mxu2 }
 0x175   :  { %v362_v15 = vpop.f32.mrf.mxu3  ;;  %v337_v18 = vadd.f32 %v336_v14, %v295_v12 }
 0x176   :  { %v363_v19 = vadd.f32 %v362_v15, %v295_v12 }
 0x177   :  { %v369_v22 = vmax.f32 %v337_v18, 0.0 }
 0x178   :  { %v370_v23 = vmax.f32 %v363_v19, 0.0 }
 0x179   :  { %588 = vmatpush.msk.msrb.mxu2 %vm306_vm1, %v369_v22 }
 0x17a   :  { %592 = vmatpush.msk.msrb.mxu3 %vm306_vm1, %v370_v23 }
 0x17b   :  { %415 = vmatpush.msrb.mxu2 %v367_v24 }
 0x17c   :  { %441 = vmatpush.msrb.mxu3 %v368_v25 }
 0x17d   :  { %416 = vmatpush.msrb.mxu2 %v365_v26 }
 0x17e   :  { %442 = vmatpush.msrb.mxu3 %v366_v27  ;;  %589 = vmatmul.msk.f32.vlgmr.msrb.gmra.mxu2 %vm118_vm0, %v63_v28 }
 0x17f   :  { %593 = vmatmul.msk.f32.vlgmr.msrb.gmra.mxu3 %vm118_vm0, %v63_v28 }
 0x186   :  { %590 = vmatmul.msk.f32.gmra.mxu2 %vm118_vm0, %v64_v29 }
 0x187   :  { %594 = vmatmul.msk.f32.gmra.mxu3 %vm118_vm0, %v64_v29 }
 0x18e   :  { %591 = vmatmul.msk.f32.gmra.mxu2 %vm118_vm0, %v65_v30 }
 0x18f   :  { %595 = vmatmul.msk.f32.gmra.mxu3 %vm118_vm0, %v65_v30 }
 0x201   :  { %v418_v31 = vpop.f32.mrf.mxu2 }
 0x202   :  { %v444_v32 = vpop.f32.mrf.mxu3  ;;  %v419_v44 = vadd.f32 %v418_v31, %v374_v43 }
 0x203   :  { %v445_v45 = vadd.f32 %v444_v32, %v374_v43 }
 0x204   :  { %v453_v50 = vmax.f32 %v419_v44, 0.0 }
 0x205   :  { %v454_v51 = vmax.f32 %v445_v45, 0.0 }
 0x209   :  { %v421_v33 = vpop.f32.mrf.mxu2 }
 0x20a   :  { %v447_v34 = vpop.f32.mrf.mxu3  ;;  %v422_v39 = vadd.f32 %v421_v33, %v379_v36 }
 0x20b   :  { %v448_v40 = vadd.f32 %v447_v34, %v379_v36 }
 0x20c   :  { %v455_v48 = vmax.f32 %v422_v39, 0.0 }
 0x20d   :  { %v456_v49 = vmax.f32 %v448_v40, 0.0 }
 0x211   :  { %v424_v37 = vpop.f32.mrf.mxu2 }
 0x212   :  { %v450_v38 = vpop.f32.mrf.mxu3  ;;  %v425_v41 = vadd.f32 %v424_v37, %v384_v35 }
 0x213   :  { %v451_v42 = vadd.f32 %v450_v38, %v384_v35 }
 0x214   :  { %v457_v46 = vmax.f32 %v425_v41, 0.0 }
 0x215   :  { %v458_v47 = vmax.f32 %v451_v42, 0.0 }
 0x216   :  { %596 = vmatpush.msk.msra.mxu2 %vm306_vm1, %v457_v46 }
 0x217   :  { %598 = vmatpush.msk.msra.mxu3 %vm306_vm1, %v458_v47 }
 0x218   :  { %488 = vmatpush.msra.mxu2 %v455_v48 }
 0x219   :  { %508 = vmatpush.msra.mxu3 %v456_v49 }
 0x21a   :  { %489 = vmatpush.msra.mxu2 %v453_v50 }
 0x21b   :  { %509 = vmatpush.msra.mxu3 %v454_v51  ;;  %597 = vmatmul.msk.f32.vlgmr.msra.gmra.mxu2 %vm118_vm0, %v69_v52 }
 0x21c   :  { %599 = vmatmul.msk.f32.vlgmr.msra.gmra.mxu3 %vm118_vm0, %v69_v52 }
 0x29e   :  { %v491_v56 = vpop.f32.mrf.mxu2 }
 0x29f   :  { %v511_v57 = vpop.f32.mrf.mxu3  ;;  %v492_v59 = vadd.f32 %v491_v56, %v464_v54 }
 0x2a0   :  { %v512_v58 = vadd.f32 %v511_v57, %v464_v54 }
 0x2a2   :  { %v516_v60 = vrot.slane %v512_v58, 7 }
 0x2a4   :  { %v518_v61 = vsel %vm517_vm2, %v492_v59, %v516_v60 }
 0x2a5   :  { %524 = vst.msk [vmem:[#allocation6] sm:$0x3] %vm522_vm3, %v518_v61 }
 0x2a6   :  { %528 = vsyncadd [#allocation5], 16  ;;  %s532_s25 = sshll.u32 %s848_s9, 4  ;;  %s664_s26 = smov [#allocation6]   ;;  %s533_s25 = int_to_ptr.hbm [resolvable:$true] %s532_s25 }
 0x2a7   :  { %s530_s27 = sshll.u32 %s664_s26, 4  ;;  %s531_s27 = int_to_ptr.vmem [resolvable:$true] %s530_s27 }
 0x2a8   :  { %535 = dma.vmem_to_hbm [thread:$0]  %s531_s27, 16, %s533_s25, [#allocation5]  }
 0x2a9   :  { %658 = dma.done.wait [#allocation5], 32  }
 0x2aa   :  { %659 = vsyncadd [#allocation5], 4294967264 }
 0x2ab   :  { %540 = vsyncpa [#allocation4], 1 }
 0x2ac   :  { %541 = vsyncpa [#allocation5], 1 }

</bundles_post_ra>
